<compile_context>
chip_gen: v7x
topology: tpu7x:2x2x1
jax: 0.10.0
libtpu: 0.0.40
codegen_flags: <defaults>
</compile_context>

<pallas_src>
import functools
import math

import jax
import jax.numpy as jnp
import numpy as np
from jax import lax
from jax.experimental import pallas as pl
from jax.experimental.pallas import tpu as pltpu


def _pick_tile(dim, preferred, multiple):
    """Largest tile <= preferred that divides `dim` and is a multiple of `multiple`;
    falls back to the full dim (always a legal BlockSpec block)."""
    if dim <= preferred:
        return dim
    t = (preferred // multiple) * multiple
    while t >= multiple:
        if dim % t == 0:
            return t
        t -= multiple
    return dim


def _vmem_limit(working_set_bytes):
    # Sized from actual buffers (2x headroom for double-buffering + slack), capped so it
    # fits every generation (v7x physical VMEM is 64 MiB).
    return int(min(max(2 * working_set_bytes + (1 << 20), 4 << 20), 48 << 20))


# ----------------------------------------------------------------------------------
# Tiled linear: (M, K) @ (K, N) + (1, N)  — used for the QKV and output projections.
# ----------------------------------------------------------------------------------
def _linear_kernel(x_ref, w_ref, b_ref, o_ref):
    acc = jnp.dot(x_ref[...], w_ref[...], preferred_element_type=jnp.float32)
    o_ref[...] = (acc + b_ref[...]).astype(o_ref.dtype)


def _linear(x2d, w_t, bias, out_dtype, *, tm_pref=256, tn_pref=256):
    """x2d: (M, K) bf16; w_t: (K, N) bf16; bias: (1, N) f32 -> (M, N) out_dtype."""
    M, K = x2d.shape
    _, N = w_t.shape
    tm = _pick_tile(M, tm_pref, 8)
    tn = _pick_tile(N, tn_pref, 128)

    in_bytes = jnp.dtype(x2d.dtype).itemsize
    out_bytes = jnp.dtype(out_dtype).itemsize
    ws = (2 * (tm * K + K * tn) * in_bytes      # double-buffered x / w tiles
          + 2 * tm * tn * out_bytes             # double-buffered output tile
          + 2 * tn * 4 + tm * tn * 4)           # bias + f32 accumulator
    cost = pl.CostEstimate(
        flops=2 * M * K * N,
        transcendentals=0,
        bytes_accessed=(M * K + K * N) * in_bytes + M * N * out_bytes + N * 4)

    return pl.pallas_call(
        _linear_kernel,
        out_shape=jax.ShapeDtypeStruct((M, N), out_dtype),
        grid=(M // tm, N // tn),
        in_specs=[
            pl.BlockSpec((tm, K), lambda i, j: (i, 0)),
            pl.BlockSpec((K, tn), lambda i, j: (0, j)),
            pl.BlockSpec((1, tn), lambda i, j: (0, j)),
        ],
        out_specs=pl.BlockSpec((tm, tn), lambda i, j: (i, j)),
        compiler_params=pltpu.CompilerParams(
            dimension_semantics=("parallel", "parallel"),
            vmem_limit_bytes=_vmem_limit(ws)),
        cost_estimate=cost,
    )(x2d, w_t, bias)


# ----------------------------------------------------------------------------------
# Flash-style attention: grid (B, H, q_tiles, kv_tiles) with online softmax.
# ----------------------------------------------------------------------------------
def _flash_kernel(q_ref, k_ref, v_ref, o_ref, m_sc, l_sc, acc_sc, *, inv_scale):
    kv = pl.program_id(3)

    @pl.when(kv == 0)
    def _():
        m_sc[...] = jnp.full(m_sc.shape, -jnp.inf, dtype=m_sc.dtype)
        l_sc[...] = jnp.zeros(l_sc.shape, dtype=l_sc.dtype)
        acc_sc[...] = jnp.zeros(acc_sc.shape, dtype=acc_sc.dtype)

    # Fold 1/sqrt(head_dim) into the small (TQ, hd) q tile instead of the (TQ, TK) scores.
    q = (q_ref[0, 0].astype(jnp.float32) * inv_scale).astype(k_ref.dtype)   # (TQ, hd) bf16
    k = k_ref[0, 0]                                                         # (TK, hd) bf16
    v = v_ref[0, 0]                                                         # (TK, hd) bf16

    # q @ k^T with no explicit transpose: contract the last dim of both operands.
    s = lax.dot_general(q, k, dimension_numbers=(((1,), (1,)), ((), ())),
                        preferred_element_type=jnp.float32)                 # (TQ, TK) f32

    m_prev = m_sc[...]
    m_new = jnp.maximum(m_prev, jnp.max(s, axis=-1, keepdims=True))         # (TQ, 1) f32
    alpha = jnp.exp(m_prev - m_new)
    p = jnp.exp(s - m_new)                                                  # f32
    l_sc[...] = alpha * l_sc[...] + jnp.sum(p, axis=-1, keepdims=True)
    pv = lax.dot_general(p.astype(v.dtype), v,
                         dimension_numbers=(((1,), (0,)), ((), ())),
                         preferred_element_type=jnp.float32)                # (TQ, hd) f32
    acc_sc[...] = alpha * acc_sc[...] + pv
    m_sc[...] = m_new

    @pl.when(kv == pl.num_programs(3) - 1)
    def _():
        inv_l = pl.reciprocal(l_sc[...], approx=True)      # EUP slot, applied to (TQ,1)
        o_ref[0, 0] = (acc_sc[...] * inv_l).astype(o_ref.dtype)


def _flash_attention(q, k, v, *, tq_pref=256, tk_pref=256):
    """q, k, v: (B, H, S, hd) bf16 -> (B, H, S, hd) bf16."""
    B, H, S, hd = q.shape
    tq = _pick_tile(S, tq_pref, 8)
    tk = _pick_tile(S, tk_pref, 8)
    inv_scale = 1.0 / math.sqrt(hd)

    itemsize = jnp.dtype(q.dtype).itemsize
    ws = (2 * (tq + 2 * tk) * hd * itemsize     # double-buffered q/k/v tiles
          + 2 * tq * hd * itemsize              # double-buffered output tile
          + tq * tk * 4                         # score tile (f32)
          + tq * (hd + 2) * 4)                  # acc / m / l scratch
    cost = pl.CostEstimate(
        flops=4 * B * H * S * S * hd,
        transcendentals=B * H * S * S,
        bytes_accessed=4 * B * H * S * hd * itemsize)

    kernel = functools.partial(_flash_kernel, inv_scale=inv_scale)
    return pl.pallas_call(
        kernel,
        out_shape=jax.ShapeDtypeStruct((B, H, S, hd), q.dtype),
        grid=(B, H, S // tq, S // tk),
        in_specs=[
            pl.BlockSpec((1, 1, tq, hd), lambda b, h, qi, ki: (b, h, qi, 0)),
            pl.BlockSpec((1, 1, tk, hd), lambda b, h, qi, ki: (b, h, ki, 0)),
            pl.BlockSpec((1, 1, tk, hd), lambda b, h, qi, ki: (b, h, ki, 0)),
        ],
        out_specs=pl.BlockSpec((1, 1, tq, hd), lambda b, h, qi, ki: (b, h, qi, 0)),
        scratch_shapes=[
            pltpu.VMEM((tq, 1), jnp.float32),    # running max
            pltpu.VMEM((tq, 1), jnp.float32),    # running denom
            pltpu.VMEM((tq, hd), jnp.float32),   # running accumulator
        ],
        compiler_params=pltpu.CompilerParams(
            dimension_semantics=("parallel", "parallel", "parallel", "arbitrary"),
            vmem_limit_bytes=_vmem_limit(ws)),
        cost_estimate=cost,
    )(q, k, v)


# ----------------------------------------------------------------------------------
# Full module forward.
# ----------------------------------------------------------------------------------
def multihead_self_attention(x, w_qkv, b_qkv, w_out, b_out, *, num_heads):
    """x: (B, S, E); w_qkv: (3E, E) / w_out: (E, E) PyTorch-style Linear weights."""
    B, S, E = x.shape
    hd = E // num_heads

    # bf16 inputs for all MXU matmuls; biases and softmax stats stay f32.
    x_bf = x.astype(jnp.bfloat16).reshape(B * S, E)
    wqkv_t = jnp.transpose(w_qkv).astype(jnp.bfloat16)     # (E, 3E)
    wout_t = jnp.transpose(w_out).astype(jnp.bfloat16)     # (E, E)
    bqkv = b_qkv.reshape(1, 3 * E).astype(jnp.float32)
    bout = b_out.reshape(1, E).astype(jnp.float32)

    # 1) fused QKV projection (tiled matmul).
    qkv = _linear(x_bf, wqkv_t, bqkv, jnp.bfloat16)        # (B*S, 3E)

    # 2) head split: wrapper-side layout plumbing (no in-kernel lane slicing / concat).
    qkv = qkv.reshape(B, S, 3, num_heads, hd)
    q = jnp.transpose(qkv[:, :, 0], (0, 2, 1, 3))          # (B, H, S, hd)
    k = jnp.transpose(qkv[:, :, 1], (0, 2, 1, 3))
    v = jnp.transpose(qkv[:, :, 2], (0, 2, 1, 3))

    # 3) flash attention (online softmax, VMEM bounded by tile sizes).
    attn = _flash_attention(q, k, v)                       # (B, H, S, hd) bf16

    # 4) merge heads + output projection.
    attn = jnp.transpose(attn, (0, 2, 1, 3)).reshape(B * S, E)
    out = _linear(attn, wout_t, bout, x.dtype)             # (B*S, E)
    # TODO(synk): optional attention `mask` argument not implemented (mask=None path only).
    return out.reshape(B, S, E)


# ----------------------------------------------------------------------------------
# Reference + test.
# ----------------------------------------------------------------------------------
def _reference(x, w_qkv, b_qkv, w_out, b_out, num_heads):
    B, S, E = x.shape
    hd = E // num_heads
    qkv = x @ w_qkv.T + b_qkv                                 # (B, S, 3E)
    qkv = qkv.reshape(B, S, 3, num_heads, hd).transpose(2, 0, 3, 1, 4)
    q, k, v = qkv[0], qkv[1], qkv[2]                          # (B, H, S, hd)
    scores = jnp.einsum("bhqd,bhkd->bhqk", q, k) / math.sqrt(hd)
    probs = jax.nn.softmax(scores, axis=-1)
    attn = jnp.einsum("bhqk,bhkd->bhqd", probs, v)            # (B, H, S, hd)
    attn = attn.transpose(0, 2, 1, 3).reshape(B, S, E)
    return attn @ w_out.T + b_out


if __name__ == "__main__":
    B, S, E, H = 2, 8, 32, 4

    key = jax.random.PRNGKey(0)
    kx, k1, k2, k3, k4 = jax.random.split(key, 5)

    x = jax.random.normal(kx, (B, S, E), dtype=jnp.float32)
    # Deterministic "Linear" parameters (PyTorch shapes: weight (out, in), bias (out,)).
    lim = 1.0 / math.sqrt(E)
    w_qkv = jax.random.uniform(k1, (3 * E, E), minval=-lim, maxval=lim, dtype=jnp.float32)
    b_qkv = jax.random.uniform(k2, (3 * E,), minval=-lim, maxval=lim, dtype=jnp.float32)
    w_out = jax.random.uniform(k3, (E, E), minval=-lim, maxval=lim, dtype=jnp.float32)
    b_out = jax.random.uniform(k4, (E,), minval=-lim, maxval=lim, dtype=jnp.float32)

    out = multihead_self_attention(x, w_qkv, b_qkv, w_out, b_out, num_heads=H)
    out = jax.block_until_ready(out)

    ref = _reference(x, w_qkv, b_qkv, w_out, b_out, H)
    assert out.shape == (B, S, E)
    # bf16 matmul inputs (per perf review) => loosened tolerance vs the f32 reference.
    np.testing.assert_allclose(np.asarray(out, dtype=np.float32), np.asarray(ref),
                               rtol=5e-2, atol=5e-2)

    print("KERNEL_OK")
</pallas_src>

<mosaic_0001>
module attributes {stable_mosaic.version = 11 : i64} {
  func.func @_linear_kernel(%arg0: i32, %arg1: i32, %arg2: memref<16x32xbf16, #tpu.memory_space<vmem>>, %arg3: memref<32x96xbf16, #tpu.memory_space<vmem>>, %arg4: memref<1x96xf32, #tpu.memory_space<vmem>>, %arg5: memref<16x96xbf16, #tpu.memory_space<vmem>>) attributes {dimension_semantics = [#tpu.dimension_semantics<parallel>, #tpu.dimension_semantics<parallel>], iteration_bounds = array<i64: 1, 1>, scalar_prefetch = 0 : i64, scratch_operands = 0 : i64, tpu.core_type = #tpu.core_type<tc>, window_params = [{transform_indices = @transform_0, window_bounds = array<i64: 16, 32>}, {transform_indices = @transform_1, window_bounds = array<i64: 32, 96>}, {transform_indices = @transform_2, window_bounds = array<i64: 1, 96>}, {transform_indices = @transform_3, window_bounds = array<i64: 16, 96>}]} {
    %c0 = arith.constant 0 : index
    %c0_0 = arith.constant 0 : index
    %0 = vector.load %arg2[%c0, %c0_0] : memref<16x32xbf16, #tpu.memory_space<vmem>>, vector<16x32xbf16>
    %c0_1 = arith.constant 0 : index
    %c0_2 = arith.constant 0 : index
    %1 = vector.load %arg3[%c0_1, %c0_2] : memref<32x96xbf16, #tpu.memory_space<vmem>>, vector<32x96xbf16>
    %cst = arith.constant dense<0.000000e+00> : vector<16x96xf32>
    %2 = tpu.matmul %0, %1, %cst {dimension_numbers = #tpu.dot_dimension_numbers<[1], [0], [0], [1], [0, 0, 1, 1], [], []>} : vector<16x32xbf16>, vector<32x96xbf16>, vector<16x96xf32> -> vector<16x96xf32>
    %c0_3 = arith.constant 0 : index
    %c0_4 = arith.constant 0 : index
    %3 = vector.load %arg4[%c0_3, %c0_4] : memref<1x96xf32, #tpu.memory_space<vmem>>, vector<1x96xf32>
    %4 = vector.broadcast %3 : vector<1x96xf32> to vector<16x96xf32>
    %5 = arith.addf %2, %4 : vector<16x96xf32>
    %6 = arith.truncf %5 : vector<16x96xf32> to vector<16x96xbf16>
    %c0_5 = arith.constant 0 : index
    %c0_6 = arith.constant 0 : index
    %7 = vector.load %arg5[%c0_5, %c0_6] : memref<16x96xbf16, #tpu.memory_space<vmem>>, vector<16x96xbf16>
    tpu.vector_store %arg5[%c0_5, %c0_6], %6 {strides = array<i32>} : memref<16x96xbf16, #tpu.memory_space<vmem>>, vector<16x96xbf16>,
    return
  }
  func.func @transform_0(%arg0: i32, %arg1: i32) -> (i32, i32) {
    %c0_i32 = arith.constant 0 : i32
    %c0_i32_0 = arith.constant 0 : i32
    return %arg0, %c0_i32 : i32, i32
  }
  func.func @transform_1(%arg0: i32, %arg1: i32) -> (i32, i32) {
    %c0_i32 = arith.constant 0 : i32
    %c0_i32_0 = arith.constant 0 : i32
    return %c0_i32, %arg1 : i32, i32
  }
  func.func @transform_2(%arg0: i32, %arg1: i32) -> (i32, i32) {
    %c0_i32 = arith.constant 0 : i32
    %c0_i32_0 = arith.constant 0 : i32
    return %c0_i32, %arg1 : i32, i32
  }
  func.func @transform_3(%arg0: i32, %arg1: i32) -> (i32, i32) {
    %c0_i32 = arith.constant 0 : i32
    return %arg0, %arg1 : i32, i32
  }
}

</mosaic_0001>

<bundles_post_ra>
// kernel: tpu_custom_call.1
= control target key start
LH: loop header
LB: loop body
LE: loop exit
PB: predicated region body
PF: predicated region fallthrough
CT: control target
= control target key end

     0   :  { %8 = vsyncpa [#allocation3], 0  ;;  %s325_s0 = inlined_call_operand.hbm [shape: bf16[16,32], index: 0, kind: input, shape index: {}]   ;;  %s326_s1 = inlined_call_operand.hbm [shape: bf16[32,96], index: 1, kind: input, shape index: {}]   ;;  %s327_s2 = inlined_call_operand.vmem [shape: f32[1,96], index: 2, kind: input, shape index: {}]   ;;  %s328_s3 = inlined_call_operand.hbm [shape: bf16[16,96], index: 3, kind: output, shape index: {}]  }
   0x1   :  { %9 = vsyncpa [#allocation6], 0 }
   0x2   :  { %10 = vsyncpa [#allocation4], 0  ;;  %s250_s12 = smov [#allocation2]   ;;  %s178_s16 = scalar_lea.hbm %s325_s0, 128 }
   0x3   :  { %s16_s13 = sshll.u32 %s250_s12, 4  ;;  %p179_p0 = scmp.ne.s32.totalorder %s325_s0, %s178_s16  ;;  %s17_s13 = int_to_ptr.vmem [resolvable:$true] %s16_s13 }
   0x4   :  { %p182_p1 = scmp.lt.u32.totalorder %s178_s16, %s325_s0 }
   0x6   :  { %p184_p2 = pnand %p182_p1, %p179_p0 }
   0x8   :  { %187 = shalt.err (!%p184_p2)
}
   0x9   :  { %s188_s21 = scalar_lea.vmem %s17_s13, 128  ;;  %p193_p4 = scmp.lt.s32.totalorder %s17_s13, %s17_s13 }
   0xa   :  { %p189_p3 = scmp.ne.s32.totalorder %s17_s13, %s188_s21  ;;  %p194_p5 = scmp.lt.s32.totalorder %s188_s21, %s188_s21 }
   0xc   :  { %p195_p6 = por %p194_p5, %p193_p4 }
   0xe   :  { %p196_p7 = pnand %p195_p6, %p189_p3 }
  0x10   :  { %199 = shalt.err (!%p196_p7)
}
  0x11   :  { %s251_s22 = smov 64   ;;  %s252_s23 = smov 4  }
  0x12   :  { %22 = dma.hbm_to_vmem [thread:$0]  %s325_s0, 128, %s17_s13, [#allocation3], %s251_s22, %s251_s22, %s252_s23  }
  0x13   :  { %s253_s26 = smov [#allocation5]   ;;  %s200_s30 = scalar_lea.hbm %s326_s1, 256 }
  0x14   :  { %s28_s27 = sshll.u32 %s253_s26, 4  ;;  %p201_p8 = scmp.ne.s32.totalorder %s326_s1, %s200_s30  ;;  %s29_s27 = int_to_ptr.vmem [resolvable:$true] %s28_s27 }
  0x15   :  { %p204_p9 = scmp.lt.u32.totalorder %s200_s30, %s326_s1 }
  0x17   :  { %p206_p10 = pnand %p204_p9, %p201_p8 }
  0x19   :  { %209 = shalt.err (!%p206_p10)
}
  0x1a   :  { %s210_s8 = scalar_lea.vmem %s29_s27, 256  ;;  %p215_p12 = scmp.lt.s32.totalorder %s29_s27, %s29_s27 }
  0x1b   :  { %p211_p11 = scmp.ne.s32.totalorder %s29_s27, %s210_s8  ;;  %p216_p13 = scmp.lt.s32.totalorder %s210_s8, %s210_s8 }
  0x1d   :  { %p217_p0 = por %p216_p13, %p215_p12 }
  0x1f   :  { %p218_p1 = pnand %p217_p0, %p211_p11 }
  0x21   :  { %221 = shalt.err (!%p218_p1)
}
  0x22   :  { %34 = dma.hbm_to_vmem [thread:$0]  %s326_s1, 256, %s29_s27, [#allocation6], %s251_s22, %s251_s22, %s252_s23  }
  0x23   :  { %244 = dma.done.wait [#allocation3], 128  }
  0x24   :  { %245 = vsyncadd [#allocation3], 4294967168 }
  0x25   :  { %246 = dma.done.wait [#allocation6], 256  }
  0x26   :  { %247 = vsyncadd [#allocation6], 4294967040  ;;  %v254_v0 = vmov 0.0   ;;  %vm255_vm0 = vmmov 0   ;;  %v175_v1 = vld [vmem:[#allocation5] sm:$0xff]   ;;  %v176_v2 = vld [vmem:[#allocation5 + $0x8] sm:$0xff]  }
  0x27   :  { %160 = vmatprep.subr.bf16.mxu0 %v254_v0  ;;  %164 = vmatprep.mubr.msk.bf16.mxu0 %vm255_vm0, %v254_v0  ;;  %v177_v3 = vld [vmem:[#allocation2] sm:$0xff]   ;;  %vm74_vm1 = vcmask 261120   ;;  %vm127_vm2 = vcmask 781312   ;;  %s256_s1 = smov [#allocation7]  }
  0x28   :  { %161 = vmatpush3.bf16.msra.mxu0 %v175_v1  ;;  %v148_v4 = vld [vmem:[%s327_s2] ss:$0 sm:$0xff]  ;;  %s135_s12 = sshll.u32 %s256_s1, 4  ;;  %s136_s12 = int_to_ptr.vmem [resolvable:$true] %s135_s12 }
  0x29   :  { %162 = vmatprep.subr.bf16.mxu0 %v254_v0  ;;  %s222_s13 = scalar_lea.vmem %s136_s12, 128  ;;  %p227_p3 = scmp.lt.s32.totalorder %s136_s12, %s136_s12 }
  0x2a   :  { %p223_p2 = scmp.ne.s32.totalorder %s136_s12, %s222_s13  ;;  %p228_p4 = scmp.lt.s32.totalorder %s222_s13, %s222_s13 }
  0x2c   :  { %163 = vmatpush3.bf16.msra.mxu0 %v176_v2  ;;  %p229_p5 = por %p228_p4, %p227_p3 }
  0x2e   :  { %p230_p6 = pnand %p229_p5, %p223_p2 }
  0x2f   :  { %165 = vmatmul.mubr.msk.bf16.vlgmr.msra.gmra.mrb[0].mxu0 %vm74_vm1, %v177_v3 }
 0x102   :  { %v112_v5 = vpop.f32.mrb[0].mxu0 }
 0x103   :  { %v113_v6 = vadd.f32 %v148_v4, %v112_v5  ;;  %v166_v7 = vpop.f32.mrb[1].mxu0 }
 0x104   :  { %v115_v8 = vpop.f32.mrb[2].mxu0 }
 0x105   :  { %v155_v9 = vpack.c.bf16 %v113_v6, %v113_v6  ;;  %v116_v10 = vadd.f32 %v148_v4, %v115_v8  ;;  %v167_v11 = vpop.f32.mrb[3].mxu0 }
 0x107   :  { %v156_v12 = vpack.c.bf16 %v116_v10, %v116_v10  ;;  %128 = vst.msk [vmem:[#allocation7] sm:$0xf] %vm127_vm2, %v155_v9 }
 0x109   :  { %129 = vst.msk [vmem:[#allocation7 + $0x4] sm:$0xf] %vm127_vm2, %v156_v12 }
 0x10a   :  { %233 = shalt.err (!%p230_p6)
}
 0x10b   :  { %s234_s15 = scalar_lea.hbm %s328_s3, 128 }
 0x10c   :  { %p235_p7 = scmp.ne.s32.totalorder %s328_s3, %s234_s15  ;;  %p238_p8 = scmp.lt.u32.totalorder %s234_s15, %s328_s3 }
 0x10e   :  { %p240_p9 = pnand %p238_p8, %p235_p7 }
 0x110   :  { %243 = shalt.err (!%p240_p9)
}
 0x111   :  { %141 = dma.vmem_to_hbm [thread:$0]  %s136_s12, 128, %s328_s3, [#allocation4], %s251_s22, %s251_s22, %s252_s23  }
 0x112   :  { %248 = dma.done.wait [#allocation4], 128  }
 0x113   :  { %249 = vsyncadd [#allocation4], 4294967168 }
 0x114   :  { %145 = vsyncpa [#allocation3], 1 }
 0x115   :  { %146 = vsyncpa [#allocation6], 1 }
 0x116   :  { %147 = vsyncpa [#allocation4], 1 }

</bundles_post_ra>
